<compile_context>
chip_gen: v7x
topology: tpu7x:2x2x1
jax: 0.10.0
libtpu: 0.0.40
codegen_flags: <defaults>
</compile_context>

<pallas_src>
import jax
import jax.numpy as jnp
from jax.experimental import pallas as pl
from jax.experimental.pallas import tpu as pltpu


def _sigmoid_kernel(x_ref, o_ref):
    x = x_ref[...].astype(jnp.float32)
    # Exact sigmoid: single EUP transcendental path, no approx-reciprocal error.
    o_ref[...] = jax.nn.sigmoid(x).astype(o_ref.dtype)


def sigmoid_pallas(x):
    """x: (N, C, H, W) float32 -> elementwise sigmoid, same shape/dtype.

    Operates on a lane-dense 2-D (N*H*W, C) view; H = W = 1 for this module.
    Gridless pallas_call: the entire (tiny) tensor lives in VMEM; output aliases
    the input buffer.
    """
    n, c, h, w = x.shape
    x2d = x.reshape(n * h * w, c)  # lane-dense on the channel axis
    nelem = x2d.size
    out2d = pl.pallas_call(
        _sigmoid_kernel,
        out_shape=jax.ShapeDtypeStruct(x2d.shape, x2d.dtype),
        in_specs=[pl.BlockSpec(memory_space=pltpu.MemorySpace.VMEM)],
        out_specs=pl.BlockSpec(memory_space=pltpu.MemorySpace.VMEM),
        input_output_aliases={0: 0},
        cost_estimate=pl.CostEstimate(
            flops=2 * nelem,                      # ~add + divide per element
            transcendentals=nelem,                # one exp per element
            bytes_accessed=2 * nelem * x2d.dtype.itemsize,
        ),
    )(x2d)
    return out2d.reshape(n, c, h, w)


if __name__ == "__main__":
    key = jax.random.PRNGKey(0)
    # Shape implied by the module's forward: (1, 288, 1, 1)
    x153 = jax.random.normal(key, (1, 288, 1, 1), dtype=jnp.float32)

    out = sigmoid_pallas(x153)
    out = jax.block_until_ready(out)

    # sanity check against plain JAX (exact sigmoid => tight tolerance)
    ref = jax.nn.sigmoid(x153)
    assert out.shape == x153.shape
    assert out.dtype == x153.dtype
    assert jnp.allclose(out, ref, atol=1e-6, rtol=1e-6), "mismatch vs reference sigmoid"
    print("KERNEL_OK")
</pallas_src>

<mosaic_0001>
module attributes {stable_mosaic.version = 11 : i64} {
  func.func @_sigmoid_kernel(%arg0: memref<1x288xf32, #tpu.memory_space<vmem>>, %arg1: memref<1x288xf32, #tpu.memory_space<vmem>>) attributes {dimension_semantics = [], scalar_prefetch = 0 : i64, scratch_operands = 0 : i64, tpu.core_type = #tpu.core_type<tc>} {
    %c0 = arith.constant 0 : index
    %c0_0 = arith.constant 0 : index
    %0 = vector.load %arg0[%c0, %c0_0] : memref<1x288xf32, #tpu.memory_space<vmem>>, vector<1x288xf32>
    %1 = arith.negf %0 : vector<1x288xf32>
    %2 = math.exp %1 : vector<1x288xf32>
    %cst = arith.constant 1.000000e+00 : f32
    %3 = vector.broadcast %cst : f32 to vector<1x288xf32>
    %4 = arith.addf %3, %2 : vector<1x288xf32>
    %5 = arith.divf %3, %4 : vector<1x288xf32>
    %c0_1 = arith.constant 0 : index
    %c0_2 = arith.constant 0 : index
    %6 = vector.load %arg1[%c0_1, %c0_2] : memref<1x288xf32, #tpu.memory_space<vmem>>, vector<1x288xf32>
    tpu.vector_store %arg1[%c0_1, %c0_2], %5 {strides = array<i32>} : memref<1x288xf32, #tpu.memory_space<vmem>>, vector<1x288xf32>,
    return
  }
}

</mosaic_0001>

<bundles_post_ra>
// kernel: tpu_custom_call.1
= control target key start
LH: loop header
LB: loop body
LE: loop exit
PB: predicated region body
PF: predicated region fallthrough
CT: control target
= control target key end

     0   :  { %6 = vsyncpa [#allocation3], 0  ;;  %s139_s0 = inlined_call_operand.hbm [shape: f32[1,288], index: 0, kind: input, shape index: {}, may-alias: {0,1}]   ;;  %s140_s1 = inlined_call_operand.hbm [shape: f32[1,288], index: 1, kind: output, shape index: {}, may-alias: {0,1}]  }
   0x1   :  { %7 = vsyncpa [#allocation4], 0  ;;  %s103_s6 = smov [#allocation2]   ;;  %s55_s10 = scalar_lea.hbm %s139_s0, 48 }
   0x2   :  { %s14_s7 = sshll.u32 %s103_s6, 4  ;;  %p56_p0 = scmp.ne.s32.totalorder %s139_s0, %s55_s10  ;;  %s15_s7 = int_to_ptr.vmem [resolvable:$true] %s14_s7 }
   0x3   :  { %p59_p1 = scmp.lt.u32.totalorder %s55_s10, %s139_s0 }
   0x5   :  { %p61_p2 = pnand %p59_p1, %p56_p0 }
   0x7   :  { %64 = shalt.err (!%p61_p2)
}
   0x8   :  { %s65_s15 = scalar_lea.vmem %s15_s7, 48  ;;  %s69_s16 = scalar_lea.vmem %s15_s7, 64 }
   0x9   :  { %p66_p3 = scmp.ne.s32.totalorder %s15_s7, %s65_s15  ;;  %p70_p4 = scmp.lt.s32.totalorder %s15_s7, %s15_s7 }
   0xa   :  { %p71_p5 = scmp.lt.s32.totalorder %s69_s16, %s65_s15 }
   0xc   :  { %p72_p6 = por %p71_p5, %p70_p4 }
   0xe   :  { %p73_p7 = pnand %p72_p6, %p66_p3 }
  0x10   :  { %76 = shalt.err (!%p73_p7)
}
  0x11   :  { %17 = dma.hbm_to_vmem [thread:$0]  %s139_s0, 48, %s15_s7, [#allocation3]  }
  0x12   :  { %99 = dma.done.wait [#allocation3], 48  }
  0x13   :  { %100 = vsyncadd [#allocation3], 4294967248  ;;  %v21_v0 = vld [vmem:[#allocation2] sm:$0x7]  ;;  %v28_v4 = vlaneseq  ;;  %s104_s19 = smov [#allocation5]  }
  0x14   :  { %v48_v1 = vmul.f32 -1.442695, %v21_v0  ;;  %s39_s20 = sshll.u32 %s104_s19, 4  ;;  %s40_s20 = int_to_ptr.vmem [resolvable:$true] %s39_s20 }
  0x15   :  { %vm30_vm0 = vcmp.lt.s32.totalorder %v28_v4, 288  ;;  %s77_s21 = scalar_lea.vmem %s40_s20, 48  ;;  %s81_s22 = scalar_lea.vmem %s40_s20, 64 }
  0x16   :  { %51 = vpow2.f32 %v48_v1  ;;  %p78_p8 = scmp.ne.s32.totalorder %s40_s20, %s77_s21  ;;  %p82_p9 = scmp.lt.s32.totalorder %s40_s20, %s40_s20 }
  0x17   :  { %p83_p10 = scmp.lt.s32.totalorder %s81_s22, %s77_s21 }
  0x19   :  { %p84_p11 = por %p83_p10, %p82_p9 }
  0x1b   :  { %p85_p12 = pnand %p84_p11, %p78_p8 }
  0x20   :  { %v52_v2 = vpop.eup %51 }
  0x21   :  { %v25_v3 = vadd.f32 1.0, %v52_v2 }
  0x23   :  { %53 = vrcp.f32 %v25_v3 }
  0x2d   :  { %v54_v5 = vpop.eup %53 }
  0x2e   :  { %32 = vst.msk [vmem:[#allocation5] sm:$0x7] %vm30_vm0, %v54_v5 }
  0x2f   :  { %88 = shalt.err (!%p85_p12)
}
  0x30   :  { %s89_s24 = scalar_lea.hbm %s140_s1, 48 }
  0x31   :  { %p90_p13 = scmp.ne.s32.totalorder %s140_s1, %s89_s24  ;;  %p93_p0 = scmp.lt.u32.totalorder %s89_s24, %s140_s1 }
  0x33   :  { %p95_p1 = pnand %p93_p0, %p90_p13 }
  0x35   :  { %98 = shalt.err (!%p95_p1)
}
  0x36   :  { %42 = dma.vmem_to_hbm [thread:$0]  %s40_s20, 48, %s140_s1, [#allocation4]  }
  0x37   :  { %101 = dma.done.wait [#allocation4], 48  }
  0x38   :  { %102 = vsyncadd [#allocation4], 4294967248 }
  0x39   :  { %46 = vsyncpa [#allocation3], 1 }
  0x3a   :  { %47 = vsyncpa [#allocation4], 1 }

</bundles_post_ra>
